<compile_context>
chip_gen: v6e
topology: v6e:2x2x1
jax: 0.10.0
libtpu: 0.0.40
codegen_flags: <defaults>
</compile_context>

<pallas_src>
import math

import jax
import jax.numpy as jnp
from jax.experimental import pallas as pl
from jax.experimental.pallas import tpu as pltpu


# ----------------------------- kernels ------------------------------------ #

def conv1x1_kernel(x_ref, w_ref, b_ref, o_ref):
    # x_ref: (C_in, TILE_S)   w_ref: (C_out, C_in)   b_ref: (C_out, 1)
    # o_ref: (C_out, TILE_S)
    y = jnp.dot(w_ref[...], x_ref[...], preferred_element_type=jnp.float32)
    o_ref[...] = (y + b_ref[...].astype(jnp.float32)).astype(o_ref.dtype)


def conv1x1_kernel_batched(x_ref, w_ref, b_ref, o_ref):
    # x_ref: (Bb, C_in, TILE_S)   o_ref: (Bb, C_out, TILE_S)
    # Bb is a small static constant -> plain Python loop is fully unrolled and
    # each iteration is a clean MXU matmul with a lane-dense store (no batched
    # dot / transposes needed).
    w = w_ref[...]
    bias = b_ref[...].astype(jnp.float32)
    for b in range(x_ref.shape[0]):
        y = jnp.dot(w, x_ref[b], preferred_element_type=jnp.float32)
        o_ref[b] = (y + bias).astype(o_ref.dtype)


# --------------------------- tiling heuristics ----------------------------- #

_VMEM_BUDGET = 40 << 20        # pipelined buffers; safe on v7x (64 MiB physical)
_TARGET_STEP_BYTES = 4 << 20   # aim for ~2-8 MiB of HBM traffic per grid step
_MAX_STEP_BYTES = 16 << 20     # keep warm-up latency / buffer size bounded
_MAX_BATCH_FOLD = 16           # cap in-kernel unroll


def _divisors(n):
    ds = set()
    i = 1
    while i * i <= n:
        if n % i == 0:
            ds.add(i)
            ds.add(n // i)
        i += 1
    return sorted(ds)


def _choose_tiling(B, C_in, C_out, HW_pad, dtype_bytes):
    """Pick (spatial tile, batch fold, vmem_limit_bytes)."""
    cin_p = -(-C_in // 8) * 8
    cout_p = -(-C_out // 8) * 8
    # Resident weight/bias tiles (lane-padded), worst-case double-buffered.
    fixed = 2 * (cout_p * max(cin_p, 128) + cout_p * 128) * dtype_bytes

    def step_bytes(bb, ts):
        return bb * (C_in + C_out) * ts * dtype_bytes

    def vmem_bytes(bb, ts):
        # double-buffered streamed input + output tiles + resident weight/bias
        return 2 * bb * (cin_p + cout_p) * ts * dtype_bytes + fixed

    units = HW_pad // 128
    # Keep >=2 grid steps whenever there are >=2 tiles of work (v7x: 2 TCs).
    min_steps = min(2, B * units)

    candidates = [d * 128 for d in sorted(_divisors(units), reverse=True)]
    tile_s = candidates[-1]
    for t in candidates:
        if vmem_bytes(1, t) > _VMEM_BUDGET:
            continue
        if step_bytes(1, t) > _MAX_STEP_BYTES and t != candidates[-1]:
            continue
        if B * (HW_pad // t) < min_steps:
            continue
        tile_s = t
        break

    n_s = HW_pad // tile_s
    Bb = 1
    if B > 1 and step_bytes(1, tile_s) < _TARGET_STEP_BYTES:
        for d in _divisors(B):
            if d == 1:
                continue
            if d > _MAX_BATCH_FOLD:
                break
            if (B // d) * n_s < min_steps:
                break
            if vmem_bytes(d, tile_s) > _VMEM_BUDGET:
                break
            if step_bytes(d, tile_s) > _MAX_STEP_BYTES:
                break
            Bb = d
            if step_bytes(d, tile_s) >= _TARGET_STEP_BYTES:
                break

    # Explicit scoped-VMEM limit: covers the chosen tiles with headroom, never
    # below the 32 MiB default, never above 48 MiB (safe on v7x's 64 MiB).
    vmem_limit = int(min(48 << 20, max(32 << 20, vmem_bytes(Bb, tile_s) + (4 << 20))))
    return tile_s, Bb, vmem_limit


# ------------------------------- wrapper ----------------------------------- #

def output_block_pallas(x, weight, bias):
    """x: (B, C_in, H, W), weight: (C_out, C_in, 1, 1), bias: (C_out,)
    -> (B, C_out, H, W), matching nn.Conv2d(in_c, out_c, 1)(x)."""
    B, C_in, H, W = x.shape
    C_out = weight.shape[0]
    HW = H * W
    dtype_bytes = jnp.dtype(x.dtype).itemsize

    # Free reshapes only (no activation transposes, no wrapper-side casts).
    x_flat = x.reshape(B, C_in, HW)
    HW_pad = -(-HW // 128) * 128
    if HW_pad != HW:
        # Zero-pad lanes so every tile is lane-dense; padded outputs (= bias)
        # are sliced off below.
        x_flat = jnp.pad(x_flat, ((0, 0), (0, 0), (0, HW_pad - HW)))

    tile_s, Bb, vmem_limit = _choose_tiling(B, C_in, C_out, HW_pad, dtype_bytes)
    n_s = HW_pad // tile_s
    n_b = B // Bb

    w2d = weight.reshape(C_out, C_in)
    b2d = bias.reshape(C_out, 1)

    if Bb == 1:
        kernel = conv1x1_kernel
        x_spec = pl.BlockSpec((None, C_in, tile_s), lambda b, s: (b, 0, s))
        o_spec = pl.BlockSpec((None, C_out, tile_s), lambda b, s: (b, 0, s))
    else:
        kernel = conv1x1_kernel_batched
        x_spec = pl.BlockSpec((Bb, C_in, tile_s), lambda b, s: (b, 0, s))
        o_spec = pl.BlockSpec((Bb, C_out, tile_s), lambda b, s: (b, 0, s))

    out_flat = pl.pallas_call(
        kernel,
        out_shape=jax.ShapeDtypeStruct((B, C_out, HW_pad), x.dtype),
        grid=(n_b, n_s),
        in_specs=[
            x_spec,
            pl.BlockSpec((C_out, C_in), lambda b, s: (0, 0)),  # VMEM-resident
            pl.BlockSpec((C_out, 1), lambda b, s: (0, 0)),     # VMEM-resident
        ],
        out_specs=o_spec,
        compiler_params=pltpu.CompilerParams(
            dimension_semantics=("parallel", "parallel"),
            vmem_limit_bytes=vmem_limit),
    )(x_flat, w2d, b2d)

    if HW_pad != HW:
        out_flat = out_flat[:, :, :HW]
    return out_flat.reshape(B, C_out, H, W)


# -------------------------------- demo ------------------------------------- #

if __name__ == "__main__":
    # Small shapes consistent with the module: x (B, in_c, H, W).
    B, C_in, C_out, H, W = 2, 4, 8, 16, 16

    key = jax.random.PRNGKey(0)
    kx, kw, kb = jax.random.split(key, 3)
    x = jax.random.normal(kx, (B, C_in, H, W), jnp.float32)

    # Deterministic Conv2d(kernel_size=1) init (kaiming-uniform-like bounds, bias=True).
    bound = 1.0 / math.sqrt(C_in * 1 * 1)
    weight = jax.random.uniform(kw, (C_out, C_in, 1, 1), jnp.float32, -bound, bound)
    bias = jax.random.uniform(kb, (C_out,), jnp.float32, -bound, bound)

    out = output_block_pallas(x, weight, bias)
    out = jax.block_until_ready(out)

    # Pure-JAX reference matching the PyTorch forward exactly.
    y_ref = jnp.einsum("bchw,oc->bohw", x, weight.reshape(C_out, C_in)) \
        + bias[None, :, None, None]

    assert out.shape == (B, C_out, H, W)
    err = float(jnp.max(jnp.abs(out - y_ref)))
    assert jnp.allclose(out, y_ref, atol=1e-5, rtol=1e-5), err
    print("KERNEL_OK")
</pallas_src>

<mosaic_0001>
module attributes {stable_mosaic.version = 11 : i64} {
  func.func @conv1x1_kernel(%arg0: i32, %arg1: i32, %arg2: memref<1x4x256xf32, #tpu.memory_space<vmem>>, %arg3: memref<8x4xf32, #tpu.memory_space<vmem>>, %arg4: memref<8x1xf32, #tpu.memory_space<vmem>>, %arg5: memref<1x8x256xf32, #tpu.memory_space<vmem>>) attributes {dimension_semantics = [#tpu.dimension_semantics<parallel>, #tpu.dimension_semantics<parallel>], iteration_bounds = array<i64: 2, 1>, scalar_prefetch = 0 : i64, scratch_operands = 0 : i64, tpu.core_type = #tpu.core_type<tc>, window_params = [{transform_indices = @transform_0, window_bounds = array<i64: 1, 4, 256>}, {pipeline_mode = #tpu.pipeline_mode<synchronous>, transform_indices = @transform_1, window_bounds = array<i64: 8, 4>}, {pipeline_mode = #tpu.pipeline_mode<synchronous>, transform_indices = @transform_2, window_bounds = array<i64: 8, 1>}, {transform_indices = @transform_3, window_bounds = array<i64: 1, 8, 256>}]} {
    %c0 = arith.constant 0 : index
    %c0_0 = arith.constant 0 : index
    %0 = vector.load %arg3[%c0, %c0_0] : memref<8x4xf32, #tpu.memory_space<vmem>>, vector<8x4xf32>
    %c0_1 = arith.constant 0 : index
    %c0_2 = arith.constant 0 : index
    %c0_3 = arith.constant 0 : index
    %1 = vector.load %arg2[%c0_1, %c0_2, %c0_3] : memref<1x4x256xf32, #tpu.memory_space<vmem>>, vector<1x4x256xf32>
    %2 = vector.shape_cast %1 : vector<1x4x256xf32> to vector<4x256xf32>
    %cst = arith.constant dense<0.000000e+00> : vector<8x256xf32>
    %3 = tpu.matmul %0, %2, %cst {dimension_numbers = #tpu.dot_dimension_numbers<[1], [0], [0], [1], [0, 0, 1, 1], [], []>} : vector<8x4xf32>, vector<4x256xf32>, vector<8x256xf32> -> vector<8x256xf32>
    %c0_4 = arith.constant 0 : index
    %c0_5 = arith.constant 0 : index
    %4 = vector.load %arg4[%c0_4, %c0_5] : memref<8x1xf32, #tpu.memory_space<vmem>>, vector<8x1xf32>
    %5 = vector.broadcast %4 : vector<8x1xf32> to vector<8x256xf32>
    %6 = arith.addf %3, %5 : vector<8x256xf32>
    %c0_6 = arith.constant 0 : index
    %c0_7 = arith.constant 0 : index
    %c0_8 = arith.constant 0 : index
    %7 = vector.load %arg5[%c0_6, %c0_7, %c0_8] : memref<1x8x256xf32, #tpu.memory_space<vmem>>, vector<1x8x256xf32>
    %8 = vector.shape_cast %7 : vector<1x8x256xf32> to vector<8x256xf32>
    %9 = vector.shape_cast %6 : vector<8x256xf32> to vector<1x8x256xf32>
    tpu.vector_store %arg5[%c0_6, %c0_7, %c0_8], %9 {strides = array<i32>} : memref<1x8x256xf32, #tpu.memory_space<vmem>>, vector<1x8x256xf32>,
    return
  }
  func.func @transform_0(%arg0: i32, %arg1: i32) -> (i32, i32, i32) {
    %c0_i32 = arith.constant 0 : i32
    %c0_i32_0 = arith.constant 0 : i32
    return %arg0, %c0_i32, %arg1 : i32, i32, i32
  }
  func.func @transform_1(%arg0: i32, %arg1: i32) -> (i32, i32) {
    %c0_i32 = arith.constant 0 : i32
    %c0_i32_0 = arith.constant 0 : i32
    %c0_i32_1 = arith.constant 0 : i32
    return %c0_i32, %c0_i32_0 : i32, i32
  }
  func.func @transform_2(%arg0: i32, %arg1: i32) -> (i32, i32) {
    %c0_i32 = arith.constant 0 : i32
    %c0_i32_0 = arith.constant 0 : i32
    %c0_i32_1 = arith.constant 0 : i32
    return %c0_i32, %c0_i32_0 : i32, i32
  }
  func.func @transform_3(%arg0: i32, %arg1: i32) -> (i32, i32, i32) {
    %c0_i32 = arith.constant 0 : i32
    %c0_i32_0 = arith.constant 0 : i32
    return %arg0, %c0_i32, %arg1 : i32, i32, i32
  }
}

</mosaic_0001>

<bundles_post_ra>
// kernel: tpu_custom_call.1
= control target key start
LH: loop header
LB: loop body
LE: loop exit
PB: predicated region body
PF: predicated region fallthrough
CT: control target
= control target key end

     0   :  { %8 = vsyncpa [#allocation3], 0  ;;  %s668_s0 = inlined_call_operand.vmem [shape: f32[2,4,256], index: 0, kind: input, shape index: {}]   ;;  %s669_s1 = inlined_call_operand.vmem [shape: f32[8,4], index: 1, kind: input, shape index: {}]   ;;  %s670_s2 = inlined_call_operand.vmem [shape: f32[8,1], index: 2, kind: input, shape index: {}]   ;;  %s671_s3 = inlined_call_operand.hbm [shape: f32[2,8,256], index: 3, kind: output, shape index: {}]  }
   0x1   :  { %10 = vsyncpa [#allocation3 + $0x1], 0  ;;  %s563_s12 = smov 0   ;;  %s565_s13 = smov 0  }
   0x2   :  { %s567_s14 = smov 0   ;;  %s569_s15 = smov 0  }
   0x3   :  { %s571_s16 = smov 0   ;;  %s573_s17 = smov 0  }
   0x4 LB: > { %s385_s18 = sadd.s32 4294967295, %s538_s17   ;;  %s386_s19 = sadd.s32 4294967294, %s538_s17   ;;  %s538_s17 = sphi %s573_s17, %s16_s17   ;;  %s534_s16 = sphi %s571_s16, %s678_s16   ;;  %s530_s15 = sphi %s569_s15, %s677_s15   ;;  %s526_s14 = sphi %s567_s14, %s676_s14   ;;  %s522_s13 = sphi %s565_s13, %s675_s13   ;;  %s518_s12 = sphi %s563_s12, %s674_s12  }
   0x5   : > { %s28_s20 = sadd.s32 1, %s534_s16  ;;  %s107_s21 = sadd.s32 1, %s526_s14 }
   0x6   : > { %p30_p0 = scmp.ge.s32.totalorder %s28_s20, 2  ;;  %p117_p1 = scmp.ne.s32.totalorder %s526_s14, %s522_s13 }
   0x7   : > { %p118_p2 = scmp.eq.s32.totalorder %s385_s18, 1  ;;  %p123_p3 = scmp.ne.s32.totalorder %s522_s13, %s518_s12 }
   0x8   : > { %s680_s20 = smov (%p30_p0, %s28_s20), 0  ;;  %p124_p5 = scmp.eq.s32.totalorder %s386_s19, 1 }
   0x9   : > { %p603_p4 = por %p118_p2, %p117_p1  ;;  %s102_s23 = ssub.s32 %s534_s16, %s680_s20 }
   0xa   : > { %p389_p6 = scmp.ge.s32.totalorder %s538_s17, 1  ;;  %p105_p7 = scmp.eq.s32.totalorder %s102_s23, 0 }
   0xb   : > { %p610_p8 = por %p124_p5, %p123_p3  ;;  %p161_p9 = scmp.lt.s32.totalorder %s538_s17, 3 }
   0xc   : > { %s616_s25 = scalar_select %p105_p7, %s526_s14, %s107_s21  }
   0xd   : > { %p162_p10 = pnand %p389_p6, %p161_p9 }
   0xe   : > { %p190_p11 = scmp.lt.s32.totalorder (!%p162_p10), %s530_s15, 1  ;;  %s186_s8 = sand.u32 (!%p162_p10), 1, %s522_s13  }
   0xf   : > { %165 = sbr.rel (%p162_p10) target bundleno = 239 (0xef), region = 32  ;;  %s390_s9 = sshll.u32 (!%p162_p10), %s186_s8, 4 }
  0x10   : > { %s402_s10 = sshll.u32 (!%p162_p10), %s530_s15, 8  ;;  %s188_s11 = scalar_lea.vmem (!%p162_p10), [#allocation2], %s390_s9 }
  0x11   : > { %s309_s18 = sshll.u32 (!%p162_p10), %s188_s11, 4  ;;  %s307_s23 = scalar_lea.hbm (!%p162_p10), %s671_s3, %s402_s10  ;;  %s310_s18 = int_to_ptr.vmem [resolvable:$true] %s309_s18 }
  0x12   : > { %s293_s26 = scalar_lea.sflag (!%p162_p10), [#allocation3], %s186_s8  ;;  %s462_s27 = scalar_lea.vmem (!%p162_p10), %s310_s18, 256 }
  0x13   : > { %p463_p12 = scmp.ne.s32.totalorder (!%p162_p10), %s310_s18, %s462_s27 }
  0x14   : > { %v540_v0 = vmov 0.0   ;;  %v541_v1 = vmov 0   ;;  %v202_v2 = vld [vmem:[%s670_s2] sm:$0xff]  ;;  %s191_s28 = scalar_select %p190_p11, %s530_s15, 1  ;;  %vm214_vm0 = vcmask 1043456   ;;  %vm210_vm1 = vcmask 31744  }
  0x15   : > { %283 = vmatprep.mubr.f32.mxu0 %v540_v0  ;;  %460 = vset.pattern.permute.xlu0 %v541_v1  ;;  %v200_v5 = vld [vmem:[%s669_s1] sm:$0xff]  ;;  %p464_p13 = pnand %p463_p12, %p603_p4 }
  0x16   : > { %205 = vperm.xlu0 %460, %v202_v2   ;;  %s401_s29 = sshll.u32 %s191_s28, 3  ;;  %s542_s28 = smov [#allocation2]  }
  0x17   : > { %s197_s5 = scalar_lea.vmem %s668_s0, %s401_s29  ;;  %p465_p0 = pneg %p464_p13 }
  0x18   : > { %v201_v3 = vld [vmem:[%s197_s5] sm:$0xff]  ;;  %s466_s15 = sshll.u32 %s542_s28, 4  ;;  %s467_s15 = int_to_ptr.vmem [resolvable:$false] %s466_s15 }
  0x19   : > { %v209_v4 = vcombine.high %v201_v3, %v201_v3  ;;  %s468_s29 = scalar_lea.vmem %s467_s15, 512  ;;  %p469_p1 = scmp.lt.s32.totalorder %s310_s18, %s467_s15 }
  0x1a   : > { %p470_p2 = scmp.lt.s32.totalorder %s468_s29, %s462_s27 }
  0x1b   : > { %393 = vmatprep.subr.msk.mxu0 %vm214_vm0, %v209_v4 }
  0x1c   : > { %394 = vmatpush1.msk.msra.mxu0 %vm214_vm0, %v201_v3  ;;  %p471_p3 = por %p470_p2, %p469_p1 }
  0x1d   : > { %395 = vmatmul.mubr.msk.f32.vlgmr.msra.gmra.mxu0 %vm210_vm1, %v200_v5 }
  0x1e   : > { %p472_p5 = pnand %p471_p3, %p465_p0 }
  0x91   : > { %v206_v6 = vpop.permute.xlu0 %205 }
  0xdd   : > { %v285_v7 = vpop.f32.mrf.mxu0 }
  0xde   : > { %v286_v8 = vadd.f32 %v285_v7, %v206_v6 }
  0xdf   : > { %v287_v9 = vpop.f32.mrf.mxu0 }
  0xe0   : > { %290 = vst [vmem:[%s188_s11] sm:$0xff] %v286_v8  ;;  %v288_v10 = vadd.f32 %v287_v9, %v206_v6 }
  0xe2   : > { %291 = vst [vmem:[%s188_s11 + $0x8] sm:$0xff] %v288_v10 }
  0xe3   : > { %475 = shalt.err (!%p472_p5)
}
  0xe4   : > { %s476_s30 = scalar_lea.hbm %s307_s23, 256  ;;  %s480_s6 = scalar_lea.hbm %s671_s3, 512 }
  0xe5   : > { %p477_p6 = scmp.ne.s32.totalorder %s307_s23, %s476_s30  ;;  %p481_p10 = scmp.lt.s32.totalorder %s307_s23, %s671_s3 }
  0xe6   : > { %p482_p11 = scmp.lt.s32.totalorder %s480_s6, %s476_s30 }
  0xe7   : > { %p478_p7 = pnand %p477_p6, %p603_p4 }
  0xe8   : > { %p483_p12 = por %p482_p11, %p481_p10 }
  0xe9   : > { %p479_p9 = pneg %p478_p7 }
  0xeb   : > { %p484_p13 = pnand %p483_p12, %p479_p9 }
  0xed   : > { %487 = shalt.err (!%p484_p13)
}
  0xee   : > { %403 = dma.vmem_to_hbm [thread:$0]  (%p603_p4), %s310_s18, 256, %s307_s23, %s293_s26  }
  0xef PF: > { %p409_p0 = scmp.ge.s32.totalorder %s538_s17, 2  ;;  %s321_s9 = sand.u32 1, %s518_s12  }
  0xf0   : > { %s322_s10 = scalar_lea.sflag [#allocation3], %s321_s9 }
  0xf1   : > { %p406_p1 = pnand %p409_p0, %p610_p8 }
  0xf3   : > { %p407_p2 = pneg %p406_p1 }
  0xf5   : > { %513 = dma.done.wait (%p407_p2), %s322_s10, 256  }
  0xf6   : > { %515 = vsyncadd (%p407_p2), %s322_s10, 4294967040  ;;  %s16_s17 = sadd.s32 1, %s538_s17   ;;  %s674_s12 = smov %s522_s13 }
  0xf7   : > { %p13_p3 = scmp.ge.s32.totalorder %s16_s17, 4   ;;  %s675_s13 = smov %s526_s14 }
  0xf8   : > { %s676_s14 = smov %s616_s25  ;;  %s677_s15 = smov %s534_s16 }
  0xf9   : > { %s678_s16 = smov %s680_s20  ;;  %15 = sbr.rel (!%p13_p3) target bundleno = 4 (0x4), region = 67 }
  0xfe   :  { %327 = vsyncpa [#allocation3], 1 }
  0xff   :  { %329 = vsyncpa [#allocation3 + $0x1], 1 }

</bundles_post_ra>
